<compile_context>
chip_gen: v5e
topology: v5e:2x2
jax: 0.10.0
libtpu: 0.0.40
codegen_flags: <defaults>
</compile_context>

<pallas_src>
import functools
import math

import jax
import jax.numpy as jnp
from jax import lax
from jax.experimental import pallas as pl
from jax.experimental.pallas import tpu as pltpu


# --------------------------------- fused kernel --------------------------------

def _mha_head_kernel(xq_ref, xk_ref, xv_ref,
                     wq_ref, wk_ref, wv_ref,
                     bq_ref, bk_ref, bv_ref,
                     r_ref, bias_ref,
                     out_ref, *prob_refs, lam):
    """One (batch, head) grid step.

    Blocks seen by the kernel:
      xq/xk/xv : (1, S, T)   bf16  activations (resident across the head axis)
      wq/wk/wv : (1, T, D)   bf16  per-head weight columns (1/sqrt(D) folded in wq)
      bq/bk/bv : (1, 1, D)   f32   per-head bias (1/sqrt(D) folded in bq)
      r_ref    : (1, S, S)   f32   head-invariant softmax(timestamp+rel logits)
      bias_ref : (1, S, S)   f32   additive mask bias (-1e32 where masked)
      out_ref  : (1, 1, S, D) f32
      prob_refs: optionally one (1, 1, S, S) ref (blended attention probs)
    """
    f32 = jnp.float32
    bf16 = jnp.bfloat16

    # nn.Linear per-head column slice: x @ W^T[:, hD:(h+1)D] + b[hD:(h+1)D].
    # bf16 MXU operands, f32 accumulation; contraction K = T (full width).
    q = jnp.dot(xq_ref[0], wq_ref[0], preferred_element_type=f32) + bq_ref[0]
    k = jnp.dot(xk_ref[0], wk_ref[0], preferred_element_type=f32) + bk_ref[0]
    v = jnp.dot(xv_ref[0], wv_ref[0], preferred_element_type=f32) + bv_ref[0]

    # q @ k^T without materializing a transpose (contract on D of both).
    s = lax.dot_general(q.astype(bf16), k.astype(bf16),
                        (((1,), (1,)), ((), ())),
                        preferred_element_type=f32)
    s = s + bias_ref[0]                 # additive mask (-1e32): one VPU add

    # Exact softmax normalization: these probabilities are *returned* (prob)
    # and blended into out, so no approx EUP reciprocal here.
    m = jnp.max(s, axis=-1, keepdims=True)
    e = jnp.exp(s - m)
    p = e / jnp.sum(e, axis=-1, keepdims=True)

    attn = lam * p + (1.0 - lam) * r_ref[0]

    # TODO(synk): nn.Dropout is identity at p=0 / eval; stochastic dropout is
    # not implemented here.
    out_ref[0, 0] = jnp.dot(attn.astype(bf16), v.astype(bf16),
                            preferred_element_type=f32)
    if prob_refs:
        # bf16 writeback halves the dominant HBM stream (documented accuracy
        # trade-off, ~2^-8 relative on returned probabilities).
        prob_refs[0][0, 0] = attn.astype(prob_refs[0].dtype)


def mha_forward(query, key, value, wq_t, wk_t, wv_t, bq, bk, bv,
                rel, timestamp, mask, su, lambda_, num_heads,
                return_prob=True, prob_dtype=jnp.bfloat16):
    B, S, T = query.shape
    H = num_heads
    D = T // H
    scale = 1.0 / math.sqrt(D)
    f32 = jnp.float32
    bf16 = jnp.bfloat16

    # ---- head-invariant prep: one fused XLA pass, NOT per-(b,h) grid step ----
    mf = mask.astype(f32)
    rel_m = rel.astype(f32) * mf
    # NOTE: exact ==0 comparison intentionally mirrors PyTorch
    # masked_fill(rel == 0, -100000.0).
    rel_attn = jnp.where(rel_m == 0.0, f32(-100000.0), rel_m)
    tstamp = jnp.exp(-jnp.abs(timestamp.astype(f32)) / su[0])
    tstamp = jnp.where(mask, f32(-100000.0), tstamp)
    r_attn = jax.nn.softmax(tstamp + rel_attn, axis=-1)           # (B, S, S) f32
    mask_bias = jnp.where(mask, f32(-1e32), f32(0.0))             # (B, S, S) f32

    # ---- per-head weight columns, bf16, 1/sqrt(D) folded into the q path ----
    def head_cols(w_t):                                           # (T,T) -> (H,T,D)
        return jnp.transpose(w_t.reshape(T, H, D), (1, 0, 2)).astype(bf16)

    wq_h = head_cols(wq_t * scale)
    wk_h = head_cols(wk_t)
    wv_h = head_cols(wv_t)
    bq_h = (bq * scale).reshape(H, 1, D).astype(f32)
    bk_h = bk.reshape(H, 1, D).astype(f32)
    bv_h = bv.reshape(H, 1, D).astype(f32)

    # Activations pre-cast to bf16 (they feed the MXU as bf16 anyway): halves
    # the (S,T) DMA stream and removes per-step casts.
    xq = query.astype(bf16)
    xk = key.astype(bf16)
    xv = value.astype(bf16)

    kernel = functools.partial(_mha_head_kernel, lam=float(lambda_))

    def per_batch(shape, nbytes):
        nd = len(shape)
        return pl.BlockSpec((1,) + shape, lambda b, h, _nd=nd: (b,) + (0,) * _nd)

    def per_head(shape):
        nd = len(shape)
        return pl.BlockSpec((1,) + shape, lambda b, h, _nd=nd: (h,) + (0,) * _nd)

    out_shapes = [jax.ShapeDtypeStruct((B, H, S, D), f32)]
    out_specs = [pl.BlockSpec((1, 1, S, D), lambda b, h: (b, h, 0, 0))]
    if return_prob:
        out_shapes.append(jax.ShapeDtypeStruct((B, H, S, S), prob_dtype))
        out_specs.append(pl.BlockSpec((1, 1, S, S), lambda b, h: (b, h, 0, 0)))

    # vmem_limit sized from the per-step block footprint (double-buffered) plus
    # slack for intermediates; clamped to stay below physical VMEM on v7x.
    prob_b = jnp.dtype(prob_dtype).itemsize if return_prob else 0
    step_bytes = (3 * S * T * 2            # xq/xk/xv bf16
                  + 3 * T * D * 2          # per-head weights bf16
                  + 3 * D * 4              # per-head biases
                  + 2 * S * S * 4          # r_attn + mask_bias f32
                  + S * D * 4              # out block
                  + S * S * prob_b)        # prob block
    vmem_limit = int(min(max(2 * step_bytes + (8 << 20), 32 << 20), 96 << 20))

    results = pl.pallas_call(
        kernel,
        out_shape=tuple(out_shapes),
        grid=(B, H),
        in_specs=[
            per_batch((S, T), 2), per_batch((S, T), 2), per_batch((S, T), 2),
            per_head((T, D)), per_head((T, D)), per_head((T, D)),
            per_head((1, D)), per_head((1, D)), per_head((1, D)),
            per_batch((S, S), 4), per_batch((S, S), 4),
        ],
        out_specs=tuple(out_specs),
        compiler_params=pltpu.CompilerParams(
            dimension_semantics=("parallel", "parallel"),
            vmem_limit_bytes=vmem_limit),
    )(xq, xk, xv, wq_h, wk_h, wv_h, bq_h, bk_h, bv_h, r_attn, mask_bias)

    if not isinstance(results, (tuple, list)):
        results = (results,)
    out_heads = results[0]                                        # (B, H, S, D)
    # Small (B,S,T)-sized relayout in XLA; negligible next to the prob stream.
    out = jnp.transpose(out_heads, (0, 2, 1, 3)).reshape(B, S, T)
    prob = results[1] if return_prob else None
    return out, prob


# ------------------------------- module wrapper -------------------------------

class MultiHeadedAttentionPallas:
    def __init__(self, total_size, num_heads, drop_prob, key):
        assert total_size % num_heads == 0
        self.total_size = total_size
        self.num_heads = num_heads
        self.head_size = total_size // num_heads
        self.drop_prob = drop_prob  # identity at 0.0 / eval

        ks = jax.random.split(key, 7)
        bound = 1.0 / math.sqrt(total_size)

        def mk_w(k):
            return jax.random.uniform(k, (total_size, total_size), jnp.float32,
                                      -bound, bound)

        def mk_b(k):
            return jax.random.uniform(k, (1, total_size), jnp.float32,
                                      -bound, bound)

        # store W^T so the kernel computes x @ W^T + b (matches nn.Linear)
        self.wq_t = mk_w(ks[0]).T
        self.wk_t = mk_w(ks[1]).T
        self.wv_t = mk_w(ks[2]).T
        self.bq = mk_b(ks[3])
        self.bk = mk_b(ks[4])
        self.bv = mk_b(ks[5])
        # su = nn.Parameter(torch.rand(1))
        self.su = jax.random.uniform(ks[6], (1,), jnp.float32, 0.1, 1.0)

    def __call__(self, query, key, value, rel, lambda_, timestamp,
                 encode_pos=False, mask=None, return_prob=True):
        assert mask is not None, "mask is required (timestamp path needs it)"
        return mha_forward(query, key, value,
                           self.wq_t, self.wk_t, self.wv_t,
                           self.bq, self.bk, self.bv,
                           rel, timestamp, mask, self.su,
                           lambda_, self.num_heads,
                           return_prob=return_prob)


# ------------------------------ pure-JAX reference ------------------------------

def reference(mod, query, key, value, rel, lambda_, timestamp, mask):
    B, S = query.shape[:2]
    H, D, T = mod.num_heads, mod.head_size, mod.total_size

    def lin(x, wt, b):
        return x @ wt + b

    q = lin(query, mod.wq_t, mod.bq).reshape(B, S, H, D).transpose(0, 2, 1, 3)
    k = lin(key, mod.wk_t, mod.bk).reshape(B, S, H, D).transpose(0, 2, 1, 3)
    v = lin(value, mod.wv_t, mod.bv).reshape(B, S, H, D).transpose(0, 2, 1, 3)

    m = mask[:, None, :, :]                                  # (B,1,S,S) bool
    relb = jnp.broadcast_to(rel[:, None].astype(jnp.float32), (B, H, S, S))
    tsb = jnp.broadcast_to(timestamp[:, None].astype(jnp.float32), (B, H, S, S))
    mf = m.astype(jnp.float32)

    rel_m = relb * mf
    rel_attn = jnp.where(rel_m == 0.0, -100000.0, rel_m)
    scores = jnp.einsum("bhqd,bhkd->bhqk", q, k) / math.sqrt(D)
    scores = jnp.where(m, -1e32, scores)
    tstamp = jnp.exp(-jnp.abs(tsb) / mod.su[0])
    tstamp = jnp.where(m, -100000.0, tstamp)
    prob = jax.nn.softmax(scores, axis=-1)
    r = jax.nn.softmax(tstamp + rel_attn, axis=-1)
    attn = lambda_ * prob + (1.0 - lambda_) * r
    out = jnp.einsum("bhqk,bhkd->bhqd", attn, v)
    out = out.transpose(0, 2, 1, 3).reshape(B, S, T)
    return out, attn


# ------------------------------------ main ------------------------------------

if __name__ == "__main__":
    B, S, T, H = 2, 8, 32, 4
    lambda_ = 0.5

    root = jax.random.PRNGKey(0)
    kmod, kq, kk, kv, krel, kts = jax.random.split(root, 6)

    mod = MultiHeadedAttentionPallas(total_size=T, num_heads=H, drop_prob=0.0,
                                     key=kmod)

    query = jax.random.normal(kq, (B, S, T), jnp.float32)
    key = jax.random.normal(kk, (B, S, T), jnp.float32)
    value = jax.random.normal(kv, (B, S, T), jnp.float32)
    rel = jax.random.uniform(krel, (B, S, S), jnp.float32, 0.1, 1.0)
    timestamp = jax.random.uniform(kts, (B, S, S), jnp.float32, 0.0, 50.0)
    # causal-style mask: True = masked (future positions)
    mask = jnp.broadcast_to(jnp.triu(jnp.ones((S, S), jnp.bool_), k=1), (B, S, S))

    out, prob_attn = mod(query, key, value, rel, lambda_, timestamp,
                         encode_pos=False, mask=mask)
    out = jax.block_until_ready(out)
    prob_attn = jax.block_until_ready(prob_attn)

    out_ref, prob_ref = reference(mod, query, key, value, rel, lambda_,
                                  timestamp, mask)

    assert out.shape == (B, S, T) and prob_attn.shape == (B, H, S, S)
    # bf16 MXU operands / bf16 activations+weights / bf16 prob writeback ->
    # slightly looser tolerance than a pure-f32 comparison would allow.
    assert jnp.allclose(out, out_ref, rtol=3e-2, atol=3e-2)
    assert jnp.allclose(prob_attn.astype(jnp.float32), prob_ref,
                        rtol=3e-2, atol=3e-2)

    print("KERNEL_OK")
</pallas_src>

<mosaic_0001>
module attributes {stable_mosaic.version = 11 : i64} {
  func.func @_mha_head_kernel(%arg0: i32, %arg1: i32, %arg2: memref<1x8x32xbf16, #tpu.memory_space<vmem>>, %arg3: memref<1x8x32xbf16, #tpu.memory_space<vmem>>, %arg4: memref<1x8x32xbf16, #tpu.memory_space<vmem>>, %arg5: memref<1x32x8xbf16, #tpu.memory_space<vmem>>, %arg6: memref<1x32x8xbf16, #tpu.memory_space<vmem>>, %arg7: memref<1x32x8xbf16, #tpu.memory_space<vmem>>, %arg8: memref<1x1x8xf32, #tpu.memory_space<vmem>>, %arg9: memref<1x1x8xf32, #tpu.memory_space<vmem>>, %arg10: memref<1x1x8xf32, #tpu.memory_space<vmem>>, %arg11: memref<1x8x8xf32, #tpu.memory_space<vmem>>, %arg12: memref<1x8x8xf32, #tpu.memory_space<vmem>>, %arg13: memref<1x1x8x8xf32, #tpu.memory_space<vmem>>, %arg14: memref<1x1x8x8xbf16, #tpu.memory_space<vmem>>) attributes {dimension_semantics = [#tpu.dimension_semantics<parallel>, #tpu.dimension_semantics<parallel>], iteration_bounds = array<i64: 2, 4>, scalar_prefetch = 0 : i64, scratch_operands = 0 : i64, tpu.core_type = #tpu.core_type<tc>, window_params = [{transform_indices = @transform_0, window_bounds = array<i64: 1, 8, 32>}, {transform_indices = @transform_1, window_bounds = array<i64: 1, 8, 32>}, {transform_indices = @transform_2, window_bounds = array<i64: 1, 8, 32>}, {transform_indices = @transform_3, window_bounds = array<i64: 1, 32, 8>}, {transform_indices = @transform_4, window_bounds = array<i64: 1, 32, 8>}, {transform_indices = @transform_5, window_bounds = array<i64: 1, 32, 8>}, {transform_indices = @transform_6, window_bounds = array<i64: 1, 1, 8>}, {transform_indices = @transform_7, window_bounds = array<i64: 1, 1, 8>}, {transform_indices = @transform_8, window_bounds = array<i64: 1, 1, 8>}, {transform_indices = @transform_9, window_bounds = array<i64: 1, 8, 8>}, {transform_indices = @transform_10, window_bounds = array<i64: 1, 8, 8>}, {transform_indices = @transform_11, window_bounds = array<i64: 1, 1, 8, 8>}, {transform_indices = @transform_12, window_bounds = array<i64: 1, 1, 8, 8>}]} {
    %c0 = arith.constant 0 : index
    %c0_0 = arith.constant 0 : index
    %c0_1 = arith.constant 0 : index
    %0 = vector.load %arg2[%c0, %c0_0, %c0_1] : memref<1x8x32xbf16, #tpu.memory_space<vmem>>, vector<1x8x32xbf16>
    %1 = vector.shape_cast %0 : vector<1x8x32xbf16> to vector<8x32xbf16>
    %c0_2 = arith.constant 0 : index
    %c0_3 = arith.constant 0 : index
    %c0_4 = arith.constant 0 : index
    %2 = vector.load %arg5[%c0_2, %c0_3, %c0_4] : memref<1x32x8xbf16, #tpu.memory_space<vmem>>, vector<1x32x8xbf16>
    %3 = vector.shape_cast %2 : vector<1x32x8xbf16> to vector<32x8xbf16>
    %cst = arith.constant dense<0.000000e+00> : vector<8x8xf32>
    %4 = tpu.matmul %1, %3, %cst {dimension_numbers = #tpu.dot_dimension_numbers<[1], [0], [0], [1], [0, 0, 1, 1], [], []>} : vector<8x32xbf16>, vector<32x8xbf16>, vector<8x8xf32> -> vector<8x8xf32>
    %c0_5 = arith.constant 0 : index
    %c0_6 = arith.constant 0 : index
    %c0_7 = arith.constant 0 : index
    %5 = vector.load %arg8[%c0_5, %c0_6, %c0_7] : memref<1x1x8xf32, #tpu.memory_space<vmem>>, vector<1x1x8xf32>
    %6 = vector.shape_cast %5 : vector<1x1x8xf32> to vector<1x8xf32>
    %7 = vector.broadcast %6 : vector<1x8xf32> to vector<8x8xf32>
    %8 = arith.addf %4, %7 : vector<8x8xf32>
    %c0_8 = arith.constant 0 : index
    %c0_9 = arith.constant 0 : index
    %c0_10 = arith.constant 0 : index
    %9 = vector.load %arg3[%c0_8, %c0_9, %c0_10] : memref<1x8x32xbf16, #tpu.memory_space<vmem>>, vector<1x8x32xbf16>
    %10 = vector.shape_cast %9 : vector<1x8x32xbf16> to vector<8x32xbf16>
    %c0_11 = arith.constant 0 : index
    %c0_12 = arith.constant 0 : index
    %c0_13 = arith.constant 0 : index
    %11 = vector.load %arg6[%c0_11, %c0_12, %c0_13] : memref<1x32x8xbf16, #tpu.memory_space<vmem>>, vector<1x32x8xbf16>
    %12 = vector.shape_cast %11 : vector<1x32x8xbf16> to vector<32x8xbf16>
    %cst_14 = arith.constant dense<0.000000e+00> : vector<8x8xf32>
    %13 = tpu.matmul %10, %12, %cst_14 {dimension_numbers = #tpu.dot_dimension_numbers<[1], [0], [0], [1], [0, 0, 1, 1], [], []>} : vector<8x32xbf16>, vector<32x8xbf16>, vector<8x8xf32> -> vector<8x8xf32>
    %c0_15 = arith.constant 0 : index
    %c0_16 = arith.constant 0 : index
    %c0_17 = arith.constant 0 : index
    %14 = vector.load %arg9[%c0_15, %c0_16, %c0_17] : memref<1x1x8xf32, #tpu.memory_space<vmem>>, vector<1x1x8xf32>
    %15 = vector.shape_cast %14 : vector<1x1x8xf32> to vector<1x8xf32>
    %16 = vector.broadcast %15 : vector<1x8xf32> to vector<8x8xf32>
    %17 = arith.addf %13, %16 : vector<8x8xf32>
    %c0_18 = arith.constant 0 : index
    %c0_19 = arith.constant 0 : index
    %c0_20 = arith.constant 0 : index
    %18 = vector.load %arg4[%c0_18, %c0_19, %c0_20] : memref<1x8x32xbf16, #tpu.memory_space<vmem>>, vector<1x8x32xbf16>
    %19 = vector.shape_cast %18 : vector<1x8x32xbf16> to vector<8x32xbf16>
    %c0_21 = arith.constant 0 : index
    %c0_22 = arith.constant 0 : index
    %c0_23 = arith.constant 0 : index
    %20 = vector.load %arg7[%c0_21, %c0_22, %c0_23] : memref<1x32x8xbf16, #tpu.memory_space<vmem>>, vector<1x32x8xbf16>
    %21 = vector.shape_cast %20 : vector<1x32x8xbf16> to vector<32x8xbf16>
    %cst_24 = arith.constant dense<0.000000e+00> : vector<8x8xf32>
    %22 = tpu.matmul %19, %21, %cst_24 {dimension_numbers = #tpu.dot_dimension_numbers<[1], [0], [0], [1], [0, 0, 1, 1], [], []>} : vector<8x32xbf16>, vector<32x8xbf16>, vector<8x8xf32> -> vector<8x8xf32>
    %c0_25 = arith.constant 0 : index
    %c0_26 = arith.constant 0 : index
    %c0_27 = arith.constant 0 : index
    %23 = vector.load %arg10[%c0_25, %c0_26, %c0_27] : memref<1x1x8xf32, #tpu.memory_space<vmem>>, vector<1x1x8xf32>
    %24 = vector.shape_cast %23 : vector<1x1x8xf32> to vector<1x8xf32>
    %25 = vector.broadcast %24 : vector<1x8xf32> to vector<8x8xf32>
    %26 = arith.addf %22, %25 : vector<8x8xf32>
    %27 = arith.truncf %8 : vector<8x8xf32> to vector<8x8xbf16>
    %28 = arith.truncf %17 : vector<8x8xf32> to vector<8x8xbf16>
    %cst_28 = arith.constant dense<0.000000e+00> : vector<8x8xf32>
    %29 = tpu.matmul %27, %28, %cst_28 {dimension_numbers = #tpu.dot_dimension_numbers<[1], [1], [0], [0], [0, 0, 1, 0], [], []>} : vector<8x8xbf16>, vector<8x8xbf16>, vector<8x8xf32> -> vector<8x8xf32>
    %c0_29 = arith.constant 0 : index
    %c0_30 = arith.constant 0 : index
    %c0_31 = arith.constant 0 : index
    %30 = vector.load %arg12[%c0_29, %c0_30, %c0_31] : memref<1x8x8xf32, #tpu.memory_space<vmem>>, vector<1x8x8xf32>
    %31 = vector.shape_cast %30 : vector<1x8x8xf32> to vector<8x8xf32>
    %32 = arith.addf %29, %31 : vector<8x8xf32>
    %cst_32 = arith.constant dense<0xFF800000> : vector<8xf32>
    %33 = vector.multi_reduction <maximumf>, %32, %cst_32 [1] : vector<8x8xf32> to vector<8xf32>
    %34 = vector.shape_cast %33 : vector<8xf32> to vector<8x1xf32>
    %35 = vector.broadcast %34 : vector<8x1xf32> to vector<8x8xf32>
    %36 = arith.subf %32, %35 : vector<8x8xf32>
    %37 = math.exp %36 : vector<8x8xf32>
    %cst_33 = arith.constant dense<0.000000e+00> : vector<8xf32>
    %38 = vector.multi_reduction <add>, %37, %cst_33 [1] : vector<8x8xf32> to vector<8xf32>
    %39 = vector.shape_cast %38 : vector<8xf32> to vector<8x1xf32>
    %40 = vector.broadcast %39 : vector<8x1xf32> to vector<8x8xf32>
    %41 = arith.divf %37, %40 : vector<8x8xf32>
    %cst_34 = arith.constant 5.000000e-01 : f32
    %42 = vector.broadcast %cst_34 : f32 to vector<8x8xf32>
    %43 = arith.mulf %42, %41 : vector<8x8xf32>
    %c0_35 = arith.constant 0 : index
    %c0_36 = arith.constant 0 : index
    %c0_37 = arith.constant 0 : index
    %44 = vector.load %arg11[%c0_35, %c0_36, %c0_37] : memref<1x8x8xf32, #tpu.memory_space<vmem>>, vector<1x8x8xf32>
    %45 = vector.shape_cast %44 : vector<1x8x8xf32> to vector<8x8xf32>
    %cst_38 = arith.constant 5.000000e-01 : f32
    %46 = vector.broadcast %cst_38 : f32 to vector<8x8xf32>
    %47 = arith.mulf %46, %45 : vector<8x8xf32>
    %48 = arith.addf %43, %47 : vector<8x8xf32>
    %49 = arith.truncf %48 : vector<8x8xf32> to vector<8x8xbf16>
    %50 = arith.truncf %26 : vector<8x8xf32> to vector<8x8xbf16>
    %cst_39 = arith.constant dense<0.000000e+00> : vector<8x8xf32>
    %51 = tpu.matmul %49, %50, %cst_39 {dimension_numbers = #tpu.dot_dimension_numbers<[1], [0], [0], [1], [0, 0, 1, 1], [], []>} : vector<8x8xbf16>, vector<8x8xbf16>, vector<8x8xf32> -> vector<8x8xf32>
    %c0_40 = arith.constant 0 : index
    %c0_41 = arith.constant 0 : index
    %c0_42 = arith.constant 0 : index
    %c0_43 = arith.constant 0 : index
    %52 = vector.load %arg13[%c0_40, %c0_41, %c0_42, %c0_43] : memref<1x1x8x8xf32, #tpu.memory_space<vmem>>, vector<1x1x8x8xf32>
    %53 = vector.shape_cast %52 : vector<1x1x8x8xf32> to vector<8x8xf32>
    %54 = vector.shape_cast %51 : vector<8x8xf32> to vector<1x1x8x8xf32>
    tpu.vector_store %arg13[%c0_40, %c0_41, %c0_42, %c0_43], %54 {strides = array<i32>} : memref<1x1x8x8xf32, #tpu.memory_space<vmem>>, vector<1x1x8x8xf32>,
    %55 = arith.truncf %48 : vector<8x8xf32> to vector<8x8xbf16>
    %c0_44 = arith.constant 0 : index
    %c0_45 = arith.constant 0 : index
    %c0_46 = arith.constant 0 : index
    %c0_47 = arith.constant 0 : index
    %56 = vector.load %arg14[%c0_44, %c0_45, %c0_46, %c0_47] : memref<1x1x8x8xbf16, #tpu.memory_space<vmem>>, vector<1x1x8x8xbf16>
    %57 = vector.shape_cast %56 : vector<1x1x8x8xbf16> to vector<8x8xbf16>
    %58 = vector.shape_cast %55 : vector<8x8xbf16> to vector<1x1x8x8xbf16>
    tpu.vector_store %arg14[%c0_44, %c0_45, %c0_46, %c0_47], %58 {strides = array<i32>} : memref<1x1x8x8xbf16, #tpu.memory_space<vmem>>, vector<1x1x8x8xbf16>,
    return
  }
  func.func @transform_0(%arg0: i32, %arg1: i32) -> (i32, i32, i32) {
    %c0_i32 = arith.constant 0 : i32
    %c0_i32_0 = arith.constant 0 : i32
    %c0_i32_1 = arith.constant 0 : i32
    return %arg0, %c0_i32, %c0_i32_0 : i32, i32, i32
  }
  func.func @transform_1(%arg0: i32, %arg1: i32) -> (i32, i32, i32) {
    %c0_i32 = arith.constant 0 : i32
    %c0_i32_0 = arith.constant 0 : i32
    %c0_i32_1 = arith.constant 0 : i32
    return %arg0, %c0_i32, %c0_i32_0 : i32, i32, i32
  }
  func.func @transform_2(%arg0: i32, %arg1: i32) -> (i32, i32, i32) {
    %c0_i32 = arith.constant 0 : i32
    %c0_i32_0 = arith.constant 0 : i32
    %c0_i32_1 = arith.constant 0 : i32
    return %arg0, %c0_i32, %c0_i32_0 : i32, i32, i32
  }
  func.func @transform_3(%arg0: i32, %arg1: i32) -> (i32, i32, i32) {
    %c0_i32 = arith.constant 0 : i32
    %c0_i32_0 = arith.constant 0 : i32
    %c0_i32_1 = arith.constant 0 : i32
    return %arg1, %c0_i32, %c0_i32_0 : i32, i32, i32
  }
  func.func @transform_4(%arg0: i32, %arg1: i32) -> (i32, i32, i32) {
    %c0_i32 = arith.constant 0 : i32
    %c0_i32_0 = arith.constant 0 : i32
    %c0_i32_1 = arith.constant 0 : i32
    return %arg1, %c0_i32, %c0_i32_0 : i32, i32, i32
  }
  func.func @transform_5(%arg0: i32, %arg1: i32) -> (i32, i32, i32) {
    %c0_i32 = arith.constant 0 : i32
    %c0_i32_0 = arith.constant 0 : i32
    %c0_i32_1 = arith.constant 0 : i32
    return %arg1, %c0_i32, %c0_i32_0 : i32, i32, i32
  }
  func.func @transform_6(%arg0: i32, %arg1: i32) -> (i32, i32, i32) {
    %c0_i32 = arith.constant 0 : i32
    %c0_i32_0 = arith.constant 0 : i32
    %c0_i32_1 = arith.constant 0 : i32
    return %arg1, %c0_i32, %c0_i32_0 : i32, i32, i32
  }
  func.func @transform_7(%arg0: i32, %arg1: i32) -> (i32, i32, i32) {
    %c0_i32 = arith.constant 0 : i32
    %c0_i32_0 = arith.constant 0 : i32
    %c0_i32_1 = arith.constant 0 : i32
    return %arg1, %c0_i32, %c0_i32_0 : i32, i32, i32
  }
  func.func @transform_8(%arg0: i32, %arg1: i32) -> (i32, i32, i32) {
    %c0_i32 = arith.constant 0 : i32
    %c0_i32_0 = arith.constant 0 : i32
    %c0_i32_1 = arith.constant 0 : i32
    return %arg1, %c0_i32, %c0_i32_0 : i32, i32, i32
  }
  func.func @transform_9(%arg0: i32, %arg1: i32) -> (i32, i32, i32) {
    %c0_i32 = arith.constant 0 : i32
    %c0_i32_0 = arith.constant 0 : i32
    %c0_i32_1 = arith.constant 0 : i32
    return %arg0, %c0_i32, %c0_i32_0 : i32, i32, i32
  }
  func.func @transform_10(%arg0: i32, %arg1: i32) -> (i32, i32, i32) {
    %c0_i32 = arith.constant 0 : i32
    %c0_i32_0 = arith.constant 0 : i32
    %c0_i32_1 = arith.constant 0 : i32
    return %arg0, %c0_i32, %c0_i32_0 : i32, i32, i32
  }
  func.func @transform_11(%arg0: i32, %arg1: i32) -> (i32, i32, i32, i32) {
    %c0_i32 = arith.constant 0 : i32
    %c0_i32_0 = arith.constant 0 : i32
    %c0_i32_1 = arith.constant 0 : i32
    return %arg0, %arg1, %c0_i32, %c0_i32_0 : i32, i32, i32, i32
  }
  func.func @transform_12(%arg0: i32, %arg1: i32) -> (i32, i32, i32, i32) {
    %c0_i32 = arith.constant 0 : i32
    %c0_i32_0 = arith.constant 0 : i32
    %c0_i32_1 = arith.constant 0 : i32
    return %arg0, %arg1, %c0_i32, %c0_i32_0 : i32, i32, i32, i32
  }
}

</mosaic_0001>

<bundles_post_ra>
// kernel: tpu_custom_call.1
= control target key start
LH: loop header
LB: loop body
LE: loop exit
PB: predicated region body
PF: predicated region fallthrough
CT: control target
= control target key end

     0   :  { %s1596_s0 = inlined_call_operand.vmem [shape: bf16[2,8,32], index: 0, kind: input, shape index: {}]   ;;  %s1597_s1 = inlined_call_operand.vmem [shape: bf16[2,8,32], index: 1, kind: input, shape index: {}]   ;;  %s1598_s2 = inlined_call_operand.vmem [shape: bf16[2,8,32], index: 2, kind: input, shape index: {}]   ;;  %s1599_s3 = inlined_call_operand.vmem [shape: bf16[4,32,8], index: 3, kind: input, shape index: {}]   ;;  %s1600_s4 = inlined_call_operand.vmem [shape: bf16[4,32,8], index: 4, kind: input, shape index: {}]   ;;  %s1601_s5 = inlined_call_operand.vmem [shape: bf16[4,32,8], index: 5, kind: input, shape index: {}]   ;;  %s1602_s6 = inlined_call_operand.vmem [shape: f32[4,1,8], index: 6, kind: input, shape index: {}]   ;;  %s1603_s7 = inlined_call_operand.vmem [shape: f32[4,1,8], index: 7, kind: input, shape index: {}]   ;;  %s1604_s8 = inlined_call_operand.vmem [shape: f32[4,1,8], index: 8, kind: input, shape index: {}]   ;;  %s1605_s9 = inlined_call_operand.vmem [shape: f32[2,8,8], index: 9, kind: input, shape index: {}]   ;;  %s1606_s10 = inlined_call_operand.vmem [shape: f32[2,8,8], index: 10, kind: input, shape index: {}]   ;;  %s1607_s11 = inlined_call_operand.hbm [shape: f32[2,4,8,8], index: 11, kind: output, shape index: {0}]   ;;  %s1608_s12 = inlined_call_operand.hbm [shape: bf16[2,4,8,8], index: 12, kind: output, shape index: {1}]  }
   0x1   :  { %1616 = sst [smem:[#allocation16_spill]] %s1599_s3 }
   0x2   :  { %1617 = sst [smem:[#allocation17_spill]] %s1600_s4 }
   0x3   :  { %1618 = sst [smem:[#allocation18_spill]] %s1602_s6 }
   0x4   :  { %18 = vsyncpa [#allocation3], 0 }
   0x5   :  { %20 = vsyncpa [#allocation3 + $0x1], 0 }
   0x6   :  { %21 = vsyncpa [#allocation5], 0 }
   0x7   :  { %23 = vsyncpa [#allocation5 + $0x1], 0  ;;  %s1392_s21 = smov 0   ;;  %s1394_s22 = smov 0  }
   0x8   :  { %s1396_s23 = smov 0   ;;  %s1398_s24 = smov 0  }
   0x9   :  { %s1400_s25 = smov 0   ;;  %s1402_s26 = smov 0  }
   0xa   :  { %s1404_s27 = smov 0   ;;  %s1406_s28 = smov 0  }
   0xb LB: > { %1619 = sst [smem:[#allocation8_spill]] %s1297_s21  ;;  %s1052_s29 = sadd.s32 4294967295, %s1325_s28   ;;  %s1325_s28 = sphi %s1406_s28, %s29_s28   ;;  %s1321_s27 = sphi %s1404_s27, %s1639_s27   ;;  %s1317_s26 = sphi %s1402_s26, %s1638_s26   ;;  %s1313_s25 = sphi %s1400_s25, %s1637_s25   ;;  %s1309_s24 = sphi %s1398_s24, %s1636_s24   ;;  %s1305_s23 = sphi %s1396_s23, %s1635_s23   ;;  %s1301_s22 = sphi %s1394_s22, %s1641_s22   ;;  %s1297_s21 = sphi %s1392_s21, %s1640_s21  }
   0xc   : > { %1620 = sst [smem:[#allocation9_spill]] %s1305_s23  ;;  %s1053_s30 = sadd.s32 4294967294, %s1325_s28  }
   0xd   : > { %1621 = sst [smem:[#allocation10_spill]] %s1317_s26  ;;  %s38_s13 = sadd.s32 1, %s1317_s26 }
   0xe   : > { %1622 = sst [smem:[#allocation11_spill]] %s1321_s27  ;;  %p39_p0 = scmp.ge.s32.totalorder %s38_s13, 4 }
   0xf   : > { %s41_s14 = sadd.s32 1, %s1321_s27  ;;  %p346_p1 = scmp.ne.s32.totalorder %s1305_s23, %s1301_s22 }
  0x10   : > { %p347_p2 = scmp.eq.s32.totalorder %s1052_s29, 7  ;;  %s1643_s13 = smov (%p39_p0, %s38_s13), 0 }
  0x11   : > { %1623 = sst [smem:[#allocation12_spill]] %s1643_s13  ;;  %s1645_s14 = smov (!%p39_p0, %s41_s14), %s1321_s27 }
  0x12   : > { %s332_s15 = ssub.s32 %s1317_s26, %s1643_s13  ;;  %p1443_p3 = por %p347_p2, %p346_p1 }
  0x13   : > { %p43_p4 = scmp.ge.s32.totalorder %s1645_s14, 2  ;;  %p352_p5 = scmp.ne.s32.totalorder %s1301_s22, %s1297_s21 }
  0x14   : > { %p353_p6 = scmp.eq.s32.totalorder %s1053_s30, 7  ;;  %p1056_p7 = scmp.ge.s32.totalorder %s1325_s28, 1 }
  0x15   : > { %s1647_s14 = smov (%p43_p4, %s1645_s14), 0  ;;  %p476_p9 = scmp.lt.s32.totalorder %s1325_s28, 9 }
  0x16   : > { %1625 = sst [smem:[#allocation13_spill]] %s1647_s14  ;;  %p1452_p8 = por %p353_p6, %p352_p5 }
  0x17   : > { %s331_s18 = ssub.s32 %s1321_s27, %s1647_s14  ;;  %s336_s19 = sadd.s32 1, %s1305_s23 }
  0x18   : > { %s1626_s17 = scalar_select %p1452_p8, 1, 0 }
  0x19   : > { %s333_s20 = sor.u32 %s332_s15, %s331_s18  ;;  %p477_p10 = pnand %p1056_p7, %p476_p9 }
  0x1a   : > { %1627 = sst [smem:[#allocation14_spill]] %s1626_s17  ;;  %p334_p11 = scmp.eq.s32.totalorder %s333_s20, 0 }
  0x1b   : > { %480 = sbr.rel (%p477_p10) target bundleno = 725 (0x2d5), region = 64  ;;  %p574_p12 = scmp.lt.s32.totalorder (!%p477_p10), %s1309_s24, 3 }
  0x1c   : > { %s1461_s29 = scalar_select %p334_p11, %s1305_s23, %s336_s19  }
  0x1d   : > { %p562_p13 = scmp.lt.s32.totalorder (!%p477_p10), %s1313_s25, 1  ;;  %s1629_s6 = sld [smem:[#allocation18_spill]] (!%p477_p10) }
  0x1e   : > { %1628 = sst [smem:[#allocation15_spill]] %s1461_s29  ;;  %s1219_s29 = scalar_lea.hbm (!%p477_p10), %s1608_s12, 32 }
  0x1f   : > { %s1630_s3 = sld [smem:[#allocation16_spill]] (!%p477_p10) }
  0x20   : > { %s1466_s30 = scalar_select %p574_p12, %s1309_s24, 3  ;;  %vm628_vm0 = vcmask 261120   ;;  %vm722_vm1 = vcmask 64512   ;;  %vm775_vm2 = vcmask 1043456   ;;  %vm793_vm7 = vcmask 60416  }
  0x21   : > { %s1469_s13 = scalar_select %p562_p13, %s1313_s25, 1 }
  0x22   : > { %s1472_s15 = sshll.u32 %s1466_s30, 4  ;;  %s1631_s4 = sld [smem:[#allocation17_spill]] }
  0x23   : > { %s591_s20 = scalar_lea.vmem %s1629_s6, %s1466_s30  ;;  %s1487_s21 = sshll.u32 %s1469_s13, 2 }
  0x24   : > { %s565_s6 = scalar_lea.vmem %s1596_s0, %s1487_s21  ;;  %v1192_v9 = vld [vmem:[%s591_s20] ss:$0 sm:$0xff]  ;;  %s573_s20 = scalar_lea.vmem %s1598_s2, %s1487_s21 }
  0x25   : > { %s578_s26 = scalar_lea.vmem %s1630_s3, %s1472_s15  ;;  %s569_s3 = scalar_lea.vmem %s1597_s1, %s1487_s21  ;;  %v607_v4 = vld [vmem:[%s565_s6] sm:$0xf] }
  0x26   : > { %v1111_v0 = vld [vmem:[%s578_s26 + $0x8] sm:$0xff]  ;;  %v1110_v2 = vld [vmem:[%s578_s26] sm:$0xff]  ;;  %s588_s6 = scalar_lea.vmem %s1601_s5, %s1472_s15  ;;  %s1068_s18 = sshll.u32 %s1469_s13, 3 }
  0x27   : > { %638 = vmatpush.bf16.msra.mxu0 %v1111_v0  ;;  %v645_v5 = vld [vmem:[%s569_s3] sm:$0xf]  ;;  %v1115_v17 = vld [vmem:[%s588_s6 + $0x8] sm:$0xff]  ;;  %s605_s14 = scalar_lea.vmem %s1606_s10, %s1068_s18  ;;  %s597_s21 = scalar_lea.vmem %s1604_s8, %s1466_s30 }
  0x28   : > { %s583_s17 = scalar_lea.vmem %s1631_s4, %s1472_s15  ;;  %s594_s4 = scalar_lea.vmem %s1603_s7, %s1466_s30  ;;  %712 = vmatpush.bf16.msra.mxu2 %v1115_v17  ;;  %v1114_v18 = vld [vmem:[%s588_s6] sm:$0xff] }
  0x29   : > { %v1113_v1 = vld [vmem:[%s583_s17 + $0x8] sm:$0xff]  ;;  %v1112_v3 = vld [vmem:[%s583_s17] sm:$0xff]  ;;  %s601_s3 = scalar_lea.vmem %s1605_s9, %s1068_s18  ;;  %s1101_s6 = sshll.u32 %s1313_s25, 2 }
  0x2a   : > { %675 = vmatpush.bf16.msra.mxu1 %v1113_v1  ;;  %v1193_v6 = vld [vmem:[%s594_s4] ss:$0 sm:$0xff]  ;;  %s1532_s4 = sand.u32 1, %s1301_s22   ;;  %s811_s26 = sadd.s32 %s1309_s24, %s1101_s6 }
  0x2b   : > { %639 = vmatpush.bf16.msra.mxu0 %v1110_v2  ;;  %v682_v19 = vld [vmem:[%s573_s20] sm:$0xf]  ;;  %s1058_s13 = sshll.u32 %s1532_s4, 2  ;;  %s1104_s20 = sshll.u32 %s811_s26, 2 }
  0x2c   : > { %713 = vmatpush.bf16.msra.mxu2 %v1114_v18  ;;  %v721_v20 = vld [vmem:[%s605_s14] sm:$0xff]  ;;  %s561_s17 = scalar_lea.vmem [#allocation4], %s1058_s13  ;;  %s829_s27 = scalar_lea.hbm %s1608_s12, %s1104_s20 }
  0x2d   : > { %v1194_v32 = vld [vmem:[%s597_s21] ss:$0 sm:$0xff]  ;;  %s831_s14 = sshll.u32 %s561_s17, 4  ;;  %s833_s15 = sshll.u32 %s829_s27, 4  ;;  %s832_s14 = int_to_ptr.vmem [resolvable:$true] %s831_s14  ;;  %s834_s15 = int_to_ptr.hbm [resolvable:$true] %s833_s15 }
  0x2e   : > { %676 = vmatpush.bf16.msra.mxu1 %v1112_v3  ;;  %1078 = vmatmul.msk.bf16.vlgmr.msra.gmra.mxu0 %vm628_vm0, %v607_v4  ;;  %v767_v44 = vld [vmem:[%s601_s3] sm:$0xff]  ;;  %s801_s23 = scalar_lea.sflag [#allocation5], %s1532_s4  ;;  %s1213_s21 = sshra.s32 %s834_s15, 4  ;;  %s1214_s21 = int_to_ptr.hbm [resolvable:$true] %s1213_s21 }
  0x2f   : > { %1096 = vmatmul.msk.bf16.vlgmr.msra.gmra.mxu2 %vm628_vm0, %v682_v19  ;;  %v768_v48 = vmul.f32 0.5, %v767_v44  ;;  %s1215_s30 = scalar_lea.hbm %s1214_s21, 4  ;;  %p1220_p4 = scmp.lt.s32.totalorder %s1214_s21, %s1608_s12 }
  0x30   : > { %p1216_p0 = scmp.ne.s32.totalorder %s1214_s21, %s1215_s30  ;;  %p1221_p5 = scmp.lt.s32.totalorder %s1219_s29, %s1215_s30 }
  0x31   : > { %1087 = vmatmul.msk.bf16.vlgmr.msra.gmra.mxu1 %vm628_vm0, %v645_v5 }
  0x32   : > { %p1217_p1 = pnand %p1216_p0, %p1443_p3  ;;  %p1222_p6 = por %p1221_p5, %p1220_p4 }
  0x34   : > { %p1218_p2 = pneg %p1217_p1 }
  0x36   : > { %p1223_p7 = pnand %p1222_p6, %p1218_p2 }
  0xab   : > { %v641_v7 = vpop.f32.mrf.mxu0 }
  0xac   : > { %v642_v12 = vadd.f32 %v1192_v9, %v641_v7 }
  0xae   : > { %v678_v8 = vpop.f32.mrf.mxu1  ;;  %v719_v16 = vpack.c.bf16 %v642_v12, %v642_v12 }
  0xaf   : > { %v679_v10 = vadd.f32 %v1193_v6, %v678_v8 }
  0xb1   : > { %v720_v11 = vpack.c.bf16 %v679_v10, %v679_v10 }
  0xb2   : > { %v715_v25 = vpop.f32.mrf.mxu2 }
  0xb3   : > { %v727_v13 = vsel %vm722_vm1, %v720_v11, 0  ;;  %v643_v14 = vpop.f32.mrf.mxu0  ;;  %v716_v33 = vadd.f32 %v1194_v32, %v715_v25 }
  0xb4   : > { %736 = vmatpush.bf16.xpose.msra.mxu3 %v727_v13 }
  0xb5   : > { %v771_v34 = vpack.c.bf16 %v716_v33, %v716_v33 }
  0xb6   : > { %v680_v15 = vpop.f32.mrf.mxu1 }
  0xb7   : > { %v777_v35 = vsel %vm775_vm2, %v771_v34, 0 }
  0xb8   : > { %786 = vmatpush.bf16.msrb.mxu0 %v777_v35 }
  0xba   : > { %v717_v29 = vpop.f32.mrf.mxu2 }
  0xbb   : > { %1097 = vmatmul.msk.bf16.vlgmr.msra.gmra.mxu3 %vm722_vm1, %v719_v16 }
 0x13e   : > { %v738_v21 = vpop.f32.mrf.mxu3 }
 0x13f   : > { %v739_v22 = vadd.f32 %v738_v21, %v721_v20 }
 0x141   : > { %v742_v23 = vsel %vm722_vm1, %v739_v22, -inf }
 0x142   : > { %743 = vmax.xlane.f32.xlu0 %v742_v23 }
 0x146   : > { %v740_v24 = vpop.f32.mrf.mxu3 }
 0x1b5   : > { %v744_v26 = vpop.xlane.xlu0 %743 }
 0x1b6   : > { %v745_v27 = vsub.f32 %v739_v22, %v744_v26 }
 0x1b8   : > { %v746_v28 = vmul.f32 1.442695, %v745_v27 }
 0x1ba   : > { %1195 = vpow2.f32 %v746_v28 }
 0x1c0   : > { %v1196_v30 = vpop.eup %1195 }
 0x1c1   : > { %v748_v31 = vsel %vm722_vm1, %v1196_v30, 0.0 }
 0x1c2   : > { %749 = vadd.xlane.f32.xlu0 %v748_v31 }
 0x235   : > { %v750_v36 = vpop.xlane.xlu0 %749 }
 0x236   : > { %1197 = vrcp.f32 %v750_v36  ;;  %v762_v40 = vand.u32 2147483648, %v750_v36  ;;  %v760_v42 = vand.u32 2147483647, %v750_v36  ;;  %vm756_vm4 = vweird.f32 %v750_v36 }
 0x238   : > { %v763_v45 = vor.u32 1.1754944e-38, %v762_v40  ;;  %vm761_vm6 = vcmp.eq.f32.partialorder %v760_v42, 8.507059e+37 }
 0x23c   : > { %v1198_v37 = vpop.eup %1197 }
 0x23d   : > { %v752_v38 = vmul.f32 %v1198_v37, %v750_v36  ;;  %vm757_vm3 = vweird.f32 %v1198_v37 }
 0x23e   : > { %vm758_vm5 = vmor %vm756_vm4, %vm757_vm3 }
 0x23f   : > { %v753_v39 = vsub.f32 1.0, %v752_v38 }
 0x241   : > { %v754_v41 = vmul.f32 %v1198_v37, %v753_v39 }
 0x243   : > { %v755_v43 = vadd.f32 %v1198_v37, %v754_v41 }
 0x245   : > { %v759_v46 = vsel %vm758_vm5, %v1198_v37, %v755_v43 }
 0x246   : > { %v764_v47 = vsel %vm761_vm6, %v763_v45, %v759_v46 }
 0x247   : > { %v765_v49 = vmul.f32 %v1196_v30, %v764_v47 }
 0x249   : > { %v766_v50 = vmul.f32 0.5, %v765_v49 }
 0x24b   : > { %v769_v51 = vadd.f32 %v768_v48, %v766_v50 }
 0x24d   : > { %v770_v52 = vpack.c.bf16 %v769_v51, %v769_v51 }
 0x24f   : > { %1098 = vmatmul.msk.bf16.vlgmr.msrb.gmra.mxu0 %vm722_vm1, %v770_v52  ;;  %794 = vst.msk [vmem:[%s561_s17] sm:$0xf] %vm793_vm7, %v770_v52 }
 0x250   : > { %1226 = shalt.err (!%p1223_p7)
}
 0x251   : > { %1117 = dma.vmem_to_hbm [thread:$0]  (%p1443_p3), %s832_s14, 64, %s834_s15, %s801_s23  }
 0x252   : > { %s1102_s6 = sshll.u32 %s811_s26, 3  ;;  %s1057_s17 = sshll.u32 %s1532_s4, 3 }
 0x253   : > { %s813_s19 = scalar_lea.hbm %s1607_s11, %s1102_s6  ;;  %s554_s27 = scalar_lea.vmem [#allocation2], %s1057_s17 }
 0x254   : > { %s815_s24 = sshll.u32 %s554_s27, 4  ;;  %s817_s25 = sshll.u32 %s813_s19, 4  ;;  %s816_s24 = int_to_ptr.vmem [resolvable:$true] %s815_s24  ;;  %s818_s25 = int_to_ptr.hbm [resolvable:$true] %s817_s25 }
 0x255   : > { %s796_s21 = scalar_lea.sflag [#allocation3], %s1532_s4  ;;  %s1241_s30 = sshra.s32 %s818_s25, 4  ;;  %s1242_s30 = int_to_ptr.hbm [resolvable:$true] %s1241_s30 }
 0x256   : > { %s1243_s29 = scalar_lea.hbm %s1242_s30, 8  ;;  %s1247_s15 = scalar_lea.hbm %s1607_s11, 64 }
 0x257   : > { %p1244_p9 = scmp.ne.s32.totalorder %s1242_s30, %s1243_s29  ;;  %p1248_p12 = scmp.lt.s32.totalorder %s1242_s30, %s1607_s11 }
 0x258   : > { %p1249_p13 = scmp.lt.s32.totalorder %s1247_s15, %s1243_s29 }
 0x259   : > { %p1245_p10 = pnand %p1244_p9, %p1443_p3 }
 0x25a   : > { %p1250_p0 = por %p1249_p13, %p1248_p12 }
 0x25b   : > { %p1246_p11 = pneg %p1245_p10 }
 0x25d   : > { %p1251_p1 = pnand %p1250_p0, %p1246_p11 }
 0x2cc   : > { %v788_v53 = vpop.f32.mrf.mxu0 }
 0x2cd   : > { %792 = vst.msk [vmem:[%s554_s27] sm:$0xff] %vm722_vm1, %v788_v53 }
 0x2ce   : > { %1254 = shalt.err (!%p1251_p1)
}
 0x2cf   : > { %1116 = dma.vmem_to_hbm [thread:$0]  (%p1443_p3), %s816_s24, 128, %s818_s25, %s796_s21  }
 0x2d4   : > { %v790_v54 = vpop.f32.mrf.mxu0 }
 0x2d5 PF: > { %s1632_s4 = sld [smem:[#allocation8_spill]]  ;;  %p1127_p2 = scmp.ge.s32.totalorder %s1325_s28, 2 }
 0x2d7   : > { %p1121_p4 = pnand %p1127_p2, %p1452_p8 }
 0x2d9   : > { %p1122_p5 = pneg %p1121_p4 }
 0x2db   : > { %s845_s6 = sand.u32 1, %s1632_s4  }
 0x2dc   : > { %s846_s17 = scalar_lea.sflag [#allocation3], %s845_s6 }
 0x2dd   : > { %1288 = dma.done.wait (%p1122_p5), %s846_s17, 128  }
 0x2de   : > { %1290 = vsyncadd (%p1122_p5), %s846_s17, 4294967168  ;;  %s856_s20 = scalar_lea.sflag [#allocation5], %s845_s6 }
 0x2df   : > { %1292 = dma.done.wait (%p1122_p5), %s856_s20, 64  }
 0x2e0   : > { %1294 = vsyncadd (%p1122_p5), %s856_s20, 4294967232  ;;  %s29_s28 = sadd.s32 1, %s1325_s28   ;;  %s1634_s16 = sld [smem:[#allocation9_spill]] }
 0x2e1   : > { %p26_p6 = scmp.ge.s32.totalorder %s29_s28, 10   ;;  %s1635_s23 = sld [smem:[#allocation15_spill]] }
 0x2e2   : > { %s1636_s24 = sld [smem:[#allocation10_spill]]  ;;  %s1640_s21 = smov %s1301_s22 }
 0x2e3   : > { %s1637_s25 = sld [smem:[#allocation11_spill]]  ;;  %28 = sbr.rel (!%p26_p6) target bundleno = 11 (0xb), region = 146 }
 0x2e4   : > { %s1638_s26 = sld [smem:[#allocation12_spill]] }
 0x2e5   : > { %s1639_s27 = sld [smem:[#allocation13_spill]] }
 0x2e6   : > { %s1641_s22 = smov %s1634_s16 }
 0x2e8   :  { %862 = vsyncpa [#allocation3], 1 }
 0x2e9   :  { %864 = vsyncpa [#allocation3 + $0x1], 1 }
 0x2ea   :  { %865 = vsyncpa [#allocation5], 1 }
 0x2eb   :  { %867 = vsyncpa [#allocation5 + $0x1], 1 }

</bundles_post_ra>
